<compile_context>
chip_gen: v7x
topology: tpu7x:2x2x1
jax: 0.10.0
libtpu: 0.0.40
codegen_flags: <defaults>
</compile_context>

<pallas_src>
import math
from functools import partial

import jax
import jax.numpy as jnp
from jax.experimental import pallas as pl
from jax.experimental.pallas import tpu as pltpu


_VMEM_WORK_BUDGET = 36 << 20   # per-grid-step live-bytes target (fits v7x 64 MiB)
_VMEM_LIMIT_BYTES = 48 << 20   # raise scoped VMEM above the v5e 16 MiB default


def _round_up(x, m):
    return (x + m - 1) // m * m


def _activation(v, kind):
    if kind == "relu":
        return jnp.maximum(v, 0.0)
    # silu: x * sigmoid(x) == x / (1 + exp(-x)).  exp and the approximate
    # reciprocal both go to the EUP slot -> no VALU divide.
    return v * pl.reciprocal(1.0 + jnp.exp(-v), approx=True)
# TODO(synk): norm='LN'/'GN'/'BN' and activation='gelu' branches of
# ResConv1DBlock (and dropout) are not implemented; the module defaults
# (norm=None, 'silu') are what this kernel covers.


def _res_conv1d_block_kernel(x_ref, w1_ref, b1_ref, w2_ref, b2_ref, o_ref, *,
                             dilation, activation):
    """One ResConv1DBlock for a tile of B sequences.

    x_ref : (B, Tp, Cp)     input, time-major, channels (lane-padded) last
    w1_ref: (Cp, 3*Sp) bf16 conv1 taps, columns [k*Sp:(k+1)*Sp] = tap k (ci,co)
    b1_ref: (1, Sp)    f32
    w2_ref: (Sp, Cp)   bf16 conv2 (1x1), [ci, co]
    b2_ref: (1, Cp)    f32
    o_ref : (B, Tp, Cp)     same dtype as x_ref
    """
    B, T, Cp = x_ref.shape
    Sp = b1_ref.shape[-1]
    d = dilation
    BT = B * T

    # norm1 = Identity ; activation1 (f32), then bf16 for the MXU.
    h = _activation(x_ref[...].reshape(BT, Cp).astype(jnp.float32), activation)
    h_bf = h.astype(jnp.bfloat16)

    # conv1 (kernel 3, dilation d): a single (BT,Cp)@(Cp,3*Sp) MXU matmul with
    # f32 accumulation; tap results are lane-aligned column slices.
    #   out[t] = b1 + W0^T x[t-d] + W1^T x[t] + W2^T x[t+d]
    y = jnp.dot(h_bf, w1_ref[...], preferred_element_type=jnp.float32)
    y0 = y[:, :Sp]
    y1 = y[:, Sp:2 * Sp]
    y2 = y[:, 2 * Sp:]

    # Apply the +-d time shift on the *results* with XLU rolls.  Rows whose
    # shift would read across a sequence boundary (Conv1d zero padding) are
    # masked to zero via a per-row time index, which also removes any
    # cross-batch bleed inside the flattened (B*Tp) axis.
    t_idx = jax.lax.broadcasted_iota(jnp.int32, (B, T, 1), 1).reshape(BT, 1)
    y0_sh = pltpu.roll(y0, shift=d, axis=0)        # y0_sh[i] = y0[i-d]
    y2_sh = pltpu.roll(y2, shift=BT - d, axis=0)   # y2_sh[i] = y2[i+d]
    acc = (y1 + b1_ref[0]
           + jnp.where(t_idx >= d, y0_sh, 0.0)
           + jnp.where(t_idx < T - d, y2_sh, 0.0))

    # norm2 = Identity ; activation2 ; conv2 (1x1 conv == channel matmul).
    a_bf = _activation(acc, activation).astype(jnp.bfloat16)
    out = (jnp.dot(a_bf, w2_ref[...], preferred_element_type=jnp.float32)
           + b2_ref[0])

    # residual connection (re-read x_ref so the flattened f32 input copy is
    # not kept live across the matmuls).
    o_ref[...] = (out.reshape(B, T, Cp)
                  + x_ref[...].astype(jnp.float32)).astype(o_ref.dtype)


def pack_params(w1, b1, w2, b2):
    """Pack PyTorch-layout Conv1d params once, padded to lane-dense shapes.

    w1: (n_state, n_in, 3), b1: (n_state,)
    w2: (n_in, n_state, 1), b2: (n_in,)
    Zero padding is exact: padded input channels are zero and padded output
    channels have zero weights and bias.

    NOTE: when the real channel counts are much smaller than 128 (toy shapes),
    most MXU flops / HBM bytes are zero padding; production VQVAE widths
    (>=512) are unaffected.
    """
    S, C, K = w1.shape
    assert K == 3 and w2.shape == (C, S, 1)
    Cp, Sp = _round_up(C, 128), _round_up(S, 128)

    # conv1 taps fused along lanes into one (Cp, 3*Sp) bf16 matrix.
    w1_t = jnp.transpose(w1, (2, 1, 0)).astype(jnp.bfloat16)   # (3, C, S)
    w1p = jnp.zeros((Cp, 3 * Sp), jnp.bfloat16)
    for k in range(3):
        w1p = w1p.at[:C, k * Sp:k * Sp + S].set(w1_t[k])
    b1p = jnp.zeros((1, Sp), jnp.float32).at[0, :S].set(b1.astype(jnp.float32))

    w2p = jnp.zeros((Sp, Cp), jnp.bfloat16)
    w2p = w2p.at[:S, :C].set(jnp.transpose(w2[:, :, 0]).astype(jnp.bfloat16))
    b2p = jnp.zeros((1, Cp), jnp.float32).at[0, :C].set(b2.astype(jnp.float32))

    return dict(w1=w1p, b1=b1p, w2=w2p, b2=b2p,
                n_in=C, n_state=S, Cp=Cp, Sp=Sp)


def _pick_batch_tile(N, Tp, Cp, Sp, *, target_rows=1024,
                     budget_bytes=_VMEM_WORK_BUDGET):
    """Largest batch tile that (a) targets ~1K matmul rows, (b) fits the VMEM
    working budget, (c) leaves >= 2 grid steps when N >= 2 (v7x megacore)."""
    # rough per-(batch,time)-row bytes: double-buffered in+out blocks (f32
    # equivalent) + peak intermediates (h, tap matmul, rolls, acc, a, out).
    per_row = 16 * Cp + 10 * Cp + 30 * Sp
    max_by_vmem = max(1, int(budget_bytes // max(1, per_row * Tp)))
    want = max(1, target_rows // Tp)
    bt = max(1, min(want, max_by_vmem))
    if N >= 2:
        bt = min(bt, (N + 1) // 2)
    return max(1, min(bt, N))


def res_conv1d_block_forward_ntc(x_ntc, packed, *, dilation=1,
                                 activation="silu", batch_tile=None):
    """ResConv1DBlock on already padded (N, Tp, Cp) NTC input; returns the
    same padded layout/dtype.  Use this entry point when stacking blocks so
    the transpose/pad HBM round trips happen only at the model boundary."""
    N, Tp, Cp = x_ntc.shape
    Sp = packed["Sp"]
    assert Cp == packed["Cp"] and Tp % 8 == 0
    assert 1 <= dilation < Tp

    if batch_tile is None:
        batch_tile = _pick_batch_tile(N, Tp, Cp, Sp)
    batch_tile = max(1, min(int(batch_tile), N))
    grid_n = pl.cdiv(N, batch_tile)
    N_pad = grid_n * batch_tile
    if N_pad != N:
        x_ntc = jnp.pad(x_ntc, ((0, N_pad - N), (0, 0), (0, 0)))

    kernel = partial(_res_conv1d_block_kernel, dilation=dilation,
                     activation=activation)
    # TODO(synk): on VMEM-tight v7x configs, single-buffer the constant weight
    # blocks (constant index_map already avoids re-DMA) and tile T with a
    # +-dilation halo for very long sequences.
    out = pl.pallas_call(
        kernel,
        out_shape=jax.ShapeDtypeStruct((N_pad, Tp, Cp), x_ntc.dtype),
        grid_spec=pltpu.PrefetchScalarGridSpec(
            num_scalar_prefetch=0,
            grid=(grid_n,),
            in_specs=[
                pl.BlockSpec((batch_tile, Tp, Cp), lambda i: (i, 0, 0)),
                pl.BlockSpec((Cp, 3 * Sp), lambda i: (0, 0)),
                pl.BlockSpec((1, Sp), lambda i: (0, 0)),
                pl.BlockSpec((Sp, Cp), lambda i: (0, 0)),
                pl.BlockSpec((1, Cp), lambda i: (0, 0)),
            ],
            out_specs=pl.BlockSpec((batch_tile, Tp, Cp), lambda i: (i, 0, 0)),
        ),
        compiler_params=pltpu.CompilerParams(
            dimension_semantics=("parallel",),
            vmem_limit_bytes=_VMEM_LIMIT_BYTES,
        ),
    )(x_ntc, packed["w1"], packed["b1"], packed["w2"], packed["b2"])

    return out[:N] if N_pad != N else out


def res_conv1d_block_forward(x_nct, packed, *, dilation=1, activation="silu",
                             batch_tile=None):
    """ResConv1DBlock forward.  x_nct: (N, C, T), PyTorch layout."""
    N, C, T = x_nct.shape
    assert C == packed["n_in"] and 1 <= dilation < T
    Cp = packed["Cp"]
    Tp = _round_up(T, 8)

    # NCT -> NTC, pad time to a sublane multiple and channels to lanes.
    x_ntc = jnp.transpose(x_nct, (0, 2, 1))
    if Tp != T or Cp != C:
        x_ntc = jnp.pad(x_ntc, ((0, 0), (0, Tp - T), (0, Cp - C)))

    out = res_conv1d_block_forward_ntc(x_ntc, packed, dilation=dilation,
                                       activation=activation,
                                       batch_tile=batch_tile)
    return jnp.transpose(out[:, :T, :C], (0, 2, 1)).astype(x_nct.dtype)


def _reference_forward(x_nct, w1, b1, w2, b2, dilation, activation="silu"):
    """Pure-JAX f32 reference using lax.conv_general_dilated (NCH layout)."""
    def act(v):
        if activation == "relu":
            return jnp.maximum(v, 0.0)
        return v * jax.nn.sigmoid(v)

    h = act(x_nct)
    y1 = jax.lax.conv_general_dilated(
        h, w1, window_strides=(1,), padding=[(dilation, dilation)],
        rhs_dilation=(dilation,), dimension_numbers=("NCH", "OIH", "NCH"),
    ) + b1[None, :, None]
    a = act(y1)
    y2 = jax.lax.conv_general_dilated(
        a, w2, window_strides=(1,), padding=[(0, 0)],
        dimension_numbers=("NCH", "OIH", "NCH"),
    ) + b2[None, :, None]
    return y2 + x_nct


if __name__ == "__main__":
    # Small deterministic shapes: batch=2, n_in=32, n_state=64, time=16.
    N, C, S, T = 2, 32, 64, 16
    dilation = 1            # module default

    key = jax.random.PRNGKey(0)
    kx, k1, k2, k3, k4 = jax.random.split(key, 5)
    x = jax.random.normal(kx, (N, C, T), dtype=jnp.float32)   # PyTorch NCT

    # PyTorch Conv1d default init bounds.
    bound1 = 1.0 / math.sqrt(C * 3)   # conv1 fan_in = n_in * 3
    bound2 = 1.0 / math.sqrt(S * 1)   # conv2 fan_in = n_state * 1
    w1 = jax.random.uniform(k1, (S, C, 3), jnp.float32, -bound1, bound1)
    b1 = jax.random.uniform(k2, (S,), jnp.float32, -bound1, bound1)
    w2 = jax.random.uniform(k3, (C, S, 1), jnp.float32, -bound2, bound2)
    b2 = jax.random.uniform(k4, (C,), jnp.float32, -bound2, bound2)

    packed = pack_params(w1, b1, w2, b2)
    out = res_conv1d_block_forward(x, packed, dilation=dilation)
    out = jax.block_until_ready(out)

    ref = jax.block_until_ready(_reference_forward(x, w1, b1, w2, b2, dilation))
    assert out.shape == (N, C, T)
    max_err = float(jnp.max(jnp.abs(out - ref)))
    # bf16 MXU inputs (f32 accumulation) + approx EUP reciprocal -> loosened
    # tolerance vs the f32 reference.
    assert jnp.allclose(out, ref, atol=2e-2, rtol=2e-2), (
        f"mismatch vs reference, max|err|={max_err}")

    print("KERNEL_OK")
</pallas_src>

<mosaic_0001>
module attributes {stable_mosaic.version = 11 : i64} {
  func.func @_res_conv1d_block_kernel(%arg0: i32, %arg1: memref<1x16x128xf32, #tpu.memory_space<vmem>>, %arg2: memref<128x384xbf16, #tpu.memory_space<vmem>>, %arg3: memref<1x128xf32, #tpu.memory_space<vmem>>, %arg4: memref<128x128xbf16, #tpu.memory_space<vmem>>, %arg5: memref<1x128xf32, #tpu.memory_space<vmem>>, %arg6: memref<1x16x128xf32, #tpu.memory_space<vmem>>) attributes {dimension_semantics = [#tpu.dimension_semantics<parallel>], iteration_bounds = array<i64: 2>, scalar_prefetch = 0 : i64, scratch_operands = 0 : i64, tpu.core_type = #tpu.core_type<tc>, window_params = [{transform_indices = @transform_0, window_bounds = array<i64: 1, 16, 128>}, {pipeline_mode = #tpu.pipeline_mode<synchronous>, transform_indices = @transform_1, window_bounds = array<i64: 128, 384>}, {pipeline_mode = #tpu.pipeline_mode<synchronous>, transform_indices = @transform_2, window_bounds = array<i64: 1, 128>}, {pipeline_mode = #tpu.pipeline_mode<synchronous>, transform_indices = @transform_3, window_bounds = array<i64: 128, 128>}, {pipeline_mode = #tpu.pipeline_mode<synchronous>, transform_indices = @transform_4, window_bounds = array<i64: 1, 128>}, {transform_indices = @transform_5, window_bounds = array<i64: 1, 16, 128>}]} {
    %c0 = arith.constant 0 : index
    %c0_0 = arith.constant 0 : index
    %c0_1 = arith.constant 0 : index
    %0 = vector.load %arg1[%c0, %c0_0, %c0_1] : memref<1x16x128xf32, #tpu.memory_space<vmem>>, vector<1x16x128xf32>
    %1 = vector.shape_cast %0 : vector<1x16x128xf32> to vector<16x128xf32>
    %cst = arith.constant 0.000000e+00 : f32
    %2 = vector.broadcast %cst : f32 to vector<16x128xf32>
    %3 = arith.subf %2, %1 : vector<16x128xf32>
    %4 = math.exp %3 : vector<16x128xf32>
    %cst_2 = arith.constant 1.000000e+00 : f32
    %5 = vector.broadcast %cst_2 : f32 to vector<16x128xf32>
    %6 = arith.addf %5, %4 : vector<16x128xf32>
    %7 = tpu.reciprocal %6 {approx = true} : vector<16x128xf32> -> vector<16x128xf32>
    %8 = arith.mulf %1, %7 : vector<16x128xf32>
    %9 = arith.truncf %8 : vector<16x128xf32> to vector<16x128xbf16>
    %c0_3 = arith.constant 0 : index
    %c0_4 = arith.constant 0 : index
    %10 = vector.load %arg2[%c0_3, %c0_4] : memref<128x384xbf16, #tpu.memory_space<vmem>>, vector<128x384xbf16>
    %cst_5 = arith.constant dense<0.000000e+00> : vector<16x384xf32>
    %11 = tpu.matmul %9, %10, %cst_5 {dimension_numbers = #tpu.dot_dimension_numbers<[1], [0], [0], [1], [0, 0, 1, 1], [], []>} : vector<16x128xbf16>, vector<128x384xbf16>, vector<16x384xf32> -> vector<16x384xf32>
    %12 = vector.extract_strided_slice %11 {offsets = [0, 0], sizes = [16, 128], strides = [1, 1]} : vector<16x384xf32> to vector<16x128xf32>
    %13 = vector.extract_strided_slice %11 {offsets = [0, 128], sizes = [16, 128], strides = [1, 1]} : vector<16x384xf32> to vector<16x128xf32>
    %14 = vector.extract_strided_slice %11 {offsets = [0, 256], sizes = [16, 128], strides = [1, 1]} : vector<16x384xf32> to vector<16x128xf32>
    %15 = tpu.iota {dimensions = array<i32: 1>} : vector<1x16x1xi32>
    %16 = vector.shape_cast %15 : vector<1x16x1xi32> to vector<16x1xi32>
    %c1_i32 = arith.constant 1 : i32
    %17 = tpu.dynamic_rotate %12 by %c1_i32 dim 0 : vector<16x128xf32>, i32 -> vector<16x128xf32>
    %c15_i32 = arith.constant 15 : i32
    %18 = tpu.dynamic_rotate %14 by %c15_i32 dim 0 : vector<16x128xf32>, i32 -> vector<16x128xf32>
    %c0_6 = arith.constant 0 : index
    %c0_7 = arith.constant 0 : index
    %19 = vector.load %arg3[%c0_6, %c0_7] : memref<1x128xf32, #tpu.memory_space<vmem>>, vector<1x128xf32>
    %20 = vector.shape_cast %19 : vector<1x128xf32> to vector<128xf32>
    %21 = vector.shape_cast %20 : vector<128xf32> to vector<1x128xf32>
    %22 = vector.broadcast %21 : vector<1x128xf32> to vector<16x128xf32>
    %23 = arith.addf %13, %22 : vector<16x128xf32>
    %c1_i32_8 = arith.constant 1 : i32
    %24 = vector.broadcast %c1_i32_8 : i32 to vector<16x1xi32>
    %25 = arith.cmpi sge, %16, %24 : vector<16x1xi32>
    %cst_9 = arith.constant 0.000000e+00 : f32
    %26 = vector.shape_cast %25 : vector<16x1xi1> to vector<16x1xi1>
    %27 = vector.broadcast %26 : vector<16x1xi1> to vector<16x128xi1>
    %28 = vector.broadcast %cst_9 : f32 to vector<16x128xf32>
    %29 = arith.select %27, %17, %28 : vector<16x128xi1>, vector<16x128xf32>
    %30 = arith.addf %23, %29 : vector<16x128xf32>
    %c15_i32_10 = arith.constant 15 : i32
    %31 = vector.broadcast %c15_i32_10 : i32 to vector<16x1xi32>
    %32 = arith.cmpi slt, %16, %31 : vector<16x1xi32>
    %cst_11 = arith.constant 0.000000e+00 : f32
    %33 = vector.shape_cast %32 : vector<16x1xi1> to vector<16x1xi1>
    %34 = vector.broadcast %33 : vector<16x1xi1> to vector<16x128xi1>
    %35 = vector.broadcast %cst_11 : f32 to vector<16x128xf32>
    %36 = arith.select %34, %18, %35 : vector<16x128xi1>, vector<16x128xf32>
    %37 = arith.addf %30, %36 : vector<16x128xf32>
    %cst_12 = arith.constant 0.000000e+00 : f32
    %38 = vector.broadcast %cst_12 : f32 to vector<16x128xf32>
    %39 = arith.subf %38, %37 : vector<16x128xf32>
    %40 = math.exp %39 : vector<16x128xf32>
    %cst_13 = arith.constant 1.000000e+00 : f32
    %41 = vector.broadcast %cst_13 : f32 to vector<16x128xf32>
    %42 = arith.addf %41, %40 : vector<16x128xf32>
    %43 = tpu.reciprocal %42 {approx = true} : vector<16x128xf32> -> vector<16x128xf32>
    %44 = arith.mulf %37, %43 : vector<16x128xf32>
    %45 = arith.truncf %44 : vector<16x128xf32> to vector<16x128xbf16>
    %c0_14 = arith.constant 0 : index
    %c0_15 = arith.constant 0 : index
    %46 = vector.load %arg4[%c0_14, %c0_15] : memref<128x128xbf16, #tpu.memory_space<vmem>>, vector<128x128xbf16>
    %cst_16 = arith.constant dense<0.000000e+00> : vector<16x128xf32>
    %47 = tpu.matmul %45, %46, %cst_16 {dimension_numbers = #tpu.dot_dimension_numbers<[1], [0], [0], [1], [0, 0, 1, 1], [], []>} : vector<16x128xbf16>, vector<128x128xbf16>, vector<16x128xf32> -> vector<16x128xf32>
    %c0_17 = arith.constant 0 : index
    %c0_18 = arith.constant 0 : index
    %48 = vector.load %arg5[%c0_17, %c0_18] : memref<1x128xf32, #tpu.memory_space<vmem>>, vector<1x128xf32>
    %49 = vector.shape_cast %48 : vector<1x128xf32> to vector<128xf32>
    %50 = vector.shape_cast %49 : vector<128xf32> to vector<1x128xf32>
    %51 = vector.broadcast %50 : vector<1x128xf32> to vector<16x128xf32>
    %52 = arith.addf %47, %51 : vector<16x128xf32>
    %53 = vector.shape_cast %52 : vector<16x128xf32> to vector<1x16x128xf32>
    %c0_19 = arith.constant 0 : index
    %c0_20 = arith.constant 0 : index
    %c0_21 = arith.constant 0 : index
    %54 = vector.load %arg1[%c0_19, %c0_20, %c0_21] : memref<1x16x128xf32, #tpu.memory_space<vmem>>, vector<1x16x128xf32>
    %55 = arith.addf %53, %54 : vector<1x16x128xf32>
    %c0_22 = arith.constant 0 : index
    %c0_23 = arith.constant 0 : index
    %c0_24 = arith.constant 0 : index
    %56 = vector.load %arg6[%c0_22, %c0_23, %c0_24] : memref<1x16x128xf32, #tpu.memory_space<vmem>>, vector<1x16x128xf32>
    tpu.vector_store %arg6[%c0_22, %c0_23, %c0_24], %55 {strides = array<i32>} : memref<1x16x128xf32, #tpu.memory_space<vmem>>, vector<1x16x128xf32>,
    return
  }
  func.func @transform_0(%arg0: i32) -> (i32, i32, i32) {
    %c0_i32 = arith.constant 0 : i32
    %c0_i32_0 = arith.constant 0 : i32
    %c0_i32_1 = arith.constant 0 : i32
    return %arg0, %c0_i32, %c0_i32_0 : i32, i32, i32
  }
  func.func @transform_1(%arg0: i32) -> (i32, i32) {
    %c0_i32 = arith.constant 0 : i32
    %c0_i32_0 = arith.constant 0 : i32
    %c0_i32_1 = arith.constant 0 : i32
    return %c0_i32, %c0_i32_0 : i32, i32
  }
  func.func @transform_2(%arg0: i32) -> (i32, i32) {
    %c0_i32 = arith.constant 0 : i32
    %c0_i32_0 = arith.constant 0 : i32
    %c0_i32_1 = arith.constant 0 : i32
    return %c0_i32, %c0_i32_0 : i32, i32
  }
  func.func @transform_3(%arg0: i32) -> (i32, i32) {
    %c0_i32 = arith.constant 0 : i32
    %c0_i32_0 = arith.constant 0 : i32
    %c0_i32_1 = arith.constant 0 : i32
    return %c0_i32, %c0_i32_0 : i32, i32
  }
  func.func @transform_4(%arg0: i32) -> (i32, i32) {
    %c0_i32 = arith.constant 0 : i32
    %c0_i32_0 = arith.constant 0 : i32
    %c0_i32_1 = arith.constant 0 : i32
    return %c0_i32, %c0_i32_0 : i32, i32
  }
  func.func @transform_5(%arg0: i32) -> (i32, i32, i32) {
    %c0_i32 = arith.constant 0 : i32
    %c0_i32_0 = arith.constant 0 : i32
    %c0_i32_1 = arith.constant 0 : i32
    return %arg0, %c0_i32, %c0_i32_0 : i32, i32, i32
  }
}

</mosaic_0001>

<bundles_post_ra>
// kernel: tpu_custom_call.1
= control target key start
LH: loop header
LB: loop body
LE: loop exit
PB: predicated region body
PF: predicated region fallthrough
CT: control target
= control target key end

     0   :  { %10 = vsyncpa [#allocation3], 0  ;;  %s1536_s0 = inlined_call_operand.hbm [shape: f32[2,16,128], index: 0, kind: input, shape index: {}]   ;;  %s1537_s1 = inlined_call_operand.hbm [shape: bf16[128,384], index: 1, kind: input, shape index: {}]   ;;  %s1538_s2 = inlined_call_operand.vmem [shape: f32[1,128], index: 2, kind: input, shape index: {}]   ;;  %s1539_s3 = inlined_call_operand.hbm [shape: bf16[128,128], index: 3, kind: input, shape index: {}]   ;;  %s1540_s4 = inlined_call_operand.vmem [shape: f32[1,128], index: 4, kind: input, shape index: {}]   ;;  %s1541_s5 = inlined_call_operand.hbm [shape: f32[2,16,128], index: 5, kind: output, shape index: {}]  }
   0x1   :  { %12 = vsyncpa [#allocation3 + $0x1], 0 }
   0x2   :  { %13 = vsyncpa [#allocation6], 0 }
   0x3   :  { %14 = vsyncpa [#allocation4], 0 }
   0x4   :  { %16 = vsyncpa [#allocation4 + $0x1], 0  ;;  %s1258_s18 = smov 0   ;;  %s1260_s19 = smov 0  }
   0x5   :  { %s1262_s20 = smov 0   ;;  %s1264_s21 = smov 0  }
   0x6 LB: > { %s1279_s22 = sadd.s32 4294967295, %s1211_s21   ;;  %s809_s23 = sadd.s32 4294967294, %s1211_s21   ;;  %s1211_s21 = sphi %s1264_s21, %s1561_s21   ;;  %s1207_s20 = sphi %s1262_s20, %s1560_s20   ;;  %s1203_s19 = sphi %s1260_s19, %s1559_s19   ;;  %s1199_s18 = sphi %s1258_s18, %s1558_s18  }
   0x7   : > { %p42_p0 = scmp.ne.s32.totalorder %s1203_s19, %s1199_s18  ;;  %p1542_p1 = scmp.eq.s32.totalorder %s1279_s22, 0 }
   0x8   : > { %p156_p3 = scmp.eq.s32.totalorder %s809_s23, 1  ;;  %p810_p5 = scmp.ge.s32.totalorder %s1211_s21, 1 }
   0x9   : > { %p1288_p4 = por %p1542_p1, %p42_p0  ;;  %p163_p7 = scmp.lt.s32.totalorder %s1211_s21, 3 }
   0xa   : > { %p1293_p6 = por %p156_p3, %p42_p0  ;;  %s1213_s27 = smov [#allocation5]  }
   0xb   : > { %s1545_s24 = scalar_select %p1288_p4, 1, 0 }
   0xc   : > { %s1546_s25 = scalar_select %p1293_p6, 1, 0 }
   0xd   : > { %p1298_p8 = pnand %p810_p5, %p163_p7  ;;  %s175_s28 = sshll.u32 %s1213_s27, 4  ;;  %s1302_s28 = int_to_ptr.vmem [resolvable:$true] %s175_s28 }
   0xe   : > { %s1214_s30 = smov [#allocation7]   ;;  %s1055_s9 = scalar_lea.hbm %s1537_s1, 3072 }
   0xf   : > { %p933_p9 = pneg %p1298_p8  ;;  %s191_s6 = sshll.u32 %s1214_s30, 4  ;;  %s1313_s6 = int_to_ptr.vmem [resolvable:$true] %s191_s6 }
  0x10   : > { %p1056_p12 = scmp.ne.s32.totalorder %s1537_s1, %s1055_s9  ;;  %p1062_p5 = scmp.lt.u32.totalorder %s1055_s9, %s1537_s1 }
  0x11   : > { %p1309_p11 = pnand %p933_p9, %p1542_p1 }
  0x13   : > { %p1057_p13 = pneg %p1309_p11 }
  0x15   : > { %p1058_p0 = pnand %p1057_p13, %p1056_p12 }
  0x17   : > { %p1059_p3 = pneg %p1058_p0 }
  0x19   : > { %p1064_p7 = pnand %p1062_p5, %p1059_p3 }
  0x1b   : > { %1067 = shalt.err (!%p1064_p7)
}
  0x1c   : > { %s1068_s14 = scalar_lea.vmem %s1302_s28, 3072  ;;  %p1076_p2 = scmp.lt.s32.totalorder %s1302_s28, %s1302_s28 }
  0x1d   : > { %p1069_p9 = scmp.ne.s32.totalorder %s1302_s28, %s1068_s14  ;;  %p1077_p12 = scmp.lt.s32.totalorder %s1068_s14, %s1068_s14 }
  0x1f   : > { %p1071_p10 = pnand %p1069_p9, %p1057_p13  ;;  %p1078_p0 = por %p1077_p12, %p1076_p2 }
  0x21   : > { %p1072_p1 = pneg %p1071_p10 }
  0x23   : > { %p1079_p6 = pnand %p1078_p0, %p1072_p1 }
  0x25   : > { %1082 = shalt.err (!%p1079_p6)
}
  0x26   : > { %s1215_s15 = smov 192   ;;  %s1216_s16 = smov 12  }
  0x27   : > { %936 = dma.hbm_to_vmem [thread:$0]  (!%p1309_p11), %s1537_s1, 3072, %s1302_s28, [#allocation6], %s1215_s15, %s1215_s15, %s1216_s16  }
  0x28   : > { %s1083_s7 = scalar_lea.hbm %s1539_s3, 1024 }
  0x29   : > { %p1084_p2 = scmp.ne.s32.totalorder %s1539_s3, %s1083_s7  ;;  %p1090_p10 = scmp.lt.u32.totalorder %s1083_s7, %s1539_s3 }
  0x2b   : > { %p1086_p1 = pnand %p1084_p2, %p1057_p13 }
  0x2d   : > { %p1087_p6 = pneg %p1086_p1 }
  0x2f   : > { %p1092_p3 = pnand %p1090_p10, %p1087_p6 }
  0x31   : > { %1095 = shalt.err (!%p1092_p3)
}
  0x32   : > { %s1096_s28 = scalar_lea.vmem %s1313_s6, 1024  ;;  %p1104_p12 = scmp.lt.s32.totalorder %s1313_s6, %s1313_s6 }
  0x33   : > { %p1097_p5 = scmp.ne.s32.totalorder %s1313_s6, %s1096_s28  ;;  %p1105_p0 = scmp.lt.s32.totalorder %s1096_s28, %s1096_s28 }
  0x35   : > { %p1099_p7 = pnand %p1097_p5, %p1057_p13  ;;  %p1106_p2 = por %p1105_p0, %p1104_p12 }
  0x37   : > { %p1100_p9 = pneg %p1099_p7 }
  0x39   : > { %p1107_p1 = pnand %p1106_p2, %p1100_p9 }
  0x3b   : > { %1110 = shalt.err (!%p1107_p1)
}
  0x3c   : > { %s1217_s12 = smov 64   ;;  %s1218_s13 = smov 4  }
  0x3d   : > { %939 = dma.hbm_to_vmem [thread:$0]  (!%p1309_p11), %s1539_s3, 1024, %s1313_s6, [#allocation6], %s1217_s12, %s1217_s12, %s1218_s13  }
  0x3e   : > { %s1368_s16 = sadd.s32 1, %s1211_s21   ;;  %s29_s23 = sadd.s32 1, %s1207_s20 }
  0x3f   : > { %s26_s17 = ssub.s32 %s1211_s21, %s1368_s16  ;;  %p36_p6 = scmp.ne.s32.totalorder %s1207_s20, %s1203_s19 }
  0x40   : > { %p27_p13 = scmp.eq.s32.totalorder %s26_s17, 0  ;;  %p37_p10 = scmp.eq.s32.totalorder %s1211_s21, 0 }
  0x41   : > { %p1549_p5 = scmp.eq.s32.totalorder %s1279_s22, 1  ;;  %p950_p9 = scmp.lt.s32.totalorder %s1211_s21, 2 }
  0x42   : > { %s1377_s27 = scalar_select %p27_p13, %s1207_s20, %s29_s23  }
  0x43   : > { %p38_p3 = por %p37_p10, %p36_p6  ;;  %p1381_p7 = por %p1549_p5, %p36_p6 }
  0x44   : > { %s208_s29 = sand.u32 1, %s1207_s20   ;;  %s861_s6 = sshll.u32 %s1211_s21, 8 }
  0x45   : > { %s1550_s30 = scalar_select %p1381_p7, 1, 0 }
  0x46   : > { %s814_s7 = sshll.u32 %s208_s29, 4  ;;  %s1391_s10 = scalar_lea.hbm %s1536_s0, %s861_s6 }
  0x47   : > { %s212_s11 = scalar_lea.vmem [#allocation2], %s814_s7  ;;  %p1395_p11 = pnand %p950_p9, %p38_p3 }
  0x48   : > { %s219_s28 = sshll.u32 %s212_s11, 4  ;;  %s1399_s13 = scalar_lea.sflag [#allocation3], %s208_s29  ;;  %s1393_s28 = int_to_ptr.vmem [resolvable:$true] %s219_s28 }
  0x49   : > { %s1111_s14 = scalar_lea.hbm %s1391_s10, 256  ;;  %p1113_p0 = pneg %p1395_p11 }
  0x4a   : > { %p1112_p12 = scmp.ne.s32.totalorder %s1391_s10, %s1111_s14  ;;  %s1116_s23 = scalar_lea.hbm %s1536_s0, 512 }
  0x4b   : > { %p1117_p13 = scmp.lt.u32.totalorder %s1391_s10, %s1536_s0  ;;  %p1118_p6 = scmp.lt.u32.totalorder %s1116_s23, %s1111_s14 }
  0x4c   : > { %p1114_p2 = pnand %p1113_p0, %p1112_p12  ;;  %p1120_p3 = scmp.lt.u32.totalorder %s1111_s14, %s1391_s10 }
  0x4d   : > { %p1119_p10 = por %p1118_p6, %p1117_p13 }
  0x4e   : > { %p1115_p1 = pneg %p1114_p2 }
  0x4f   : > { %p1121_p5 = por %p1120_p3, %p1119_p10 }
  0x51   : > { %p1122_p9 = pnand %p1121_p5, %p1115_p1 }
  0x53   : > { %1125 = shalt.err (!%p1122_p9)
}
  0x54   : > { %s1126_s29 = scalar_lea.vmem %s1393_s28, 256  ;;  %s1219_s8 = smov [#allocation2]  }
  0x55   : > { %p1127_p12 = scmp.ne.s32.totalorder %s1393_s28, %s1126_s29  ;;  %s1131_s9 = sshll.u32 %s1219_s8, 4  ;;  %s1132_s9 = int_to_ptr.vmem [resolvable:$false] %s1131_s9 }
  0x56   : > { %s1133_s11 = scalar_lea.vmem %s1132_s9, 512  ;;  %p1134_p4 = scmp.lt.s32.totalorder %s1393_s28, %s1132_s9 }
  0x57   : > { %p1129_p2 = pnand %p1127_p12, %p1113_p0  ;;  %p1135_p13 = scmp.lt.s32.totalorder %s1133_s11, %s1126_s29 }
  0x59   : > { %p1130_p7 = pneg %p1129_p2  ;;  %p1136_p6 = por %p1135_p13, %p1134_p4 }
  0x5b   : > { %p1137_p10 = pnand %p1136_p6, %p1130_p7 }
  0x5d   : > { %1140 = shalt.err (!%p1137_p10)
}
  0x5e   : > { %s1220_s14 = smov 128   ;;  %s1221_s15 = smov 8  }
  0x5f   : > { %943 = dma.hbm_to_vmem [thread:$0]  (!%p1395_p11), %s1391_s10, 256, %s1393_s28, %s1399_s13, %s1220_s14, %s1220_s14, %s1221_s15  }
  0x60   : > { %231 = sbr.rel (%p1298_p8) target bundleno = 635 (0x27b), region = 40  ;;  %s1430_s17 = sand.u32 (!%p1298_p8), 1, %s1203_s19  }
  0x61   : > { %s818_s23 = sshll.u32 (!%p1298_p8), %s1430_s17, 4  ;;  %s234_s7 = scalar_lea.sflag (!%p1298_p8), [#allocation3], %s1430_s17 }
  0x62   : > { %s1436_s6 = scalar_lea.vmem (!%p1298_p8), [#allocation2], %s818_s23  ;;  %p1552_p4 = scmp.ne.s32.totalorder (!%p1298_p8), %s1545_s24, 0 }
  0x67   : > { %1186 = dma.done.wait (%p1552_p4), %s234_s7, 256  }
  0x68   : > { %1188 = vsyncadd (%p1552_p4), %s234_s7, 4294967040  ;;  %p1553_p7 = scmp.eq.s32.totalorder %s1279_s22, 0 }
  0x6a   : > { %1190 = dma.done.wait (%p1553_p7), [#allocation6], 4096   ;;  %p1554_p8 = pmov %p1553_p7 }
  0x6b   : > { %v1222_v0 = vmov 0.0   ;;  %vm1223_vm0 = vmmov 0   ;;  %v1224_v1 = vmov 0   ;;  %v999_v2 = vld [vmem:[#allocation5 + $0x4] ss:$12 sps:$4 sm:$0xff]   ;;  %v1457_v22 = vld [vmem:[%s1436_s6 + $0x8] sm:$0xff]  ;;  %v532_v49 = vlaneseq }
  0x6c   : > { %1192 = vsyncadd (%p1554_p8), [#allocation6], 4294963200  ;;  %881 = vmatprep.subr.bf16.mxu1 %v1222_v0  ;;  %897 = vmatprep.mubr.msk.bf16.mxu1 %vm1223_vm0, %v1222_v0  ;;  %v1001_v3 = vld [vmem:[#allocation5 + $0x8] ss:$12 sps:$4 sm:$0xff]   ;;  %v1002_v4 = vld [vmem:[#allocation5] ss:$12 sps:$4 sm:$0xff]  }
  0x6d   : > { %480 = vmatprep.mubr.bf16.mxu0 %v1224_v1  ;;  %448 = vmatprep.subr.bf16.mxu0 %v999_v2  ;;  %v1003_v5 = vld [vmem:[#allocation5 + $0x1c] ss:$12 sps:$4 sm:$0xff]   ;;  %v1005_v6 = vld [vmem:[#allocation5 + $0x20] ss:$12 sps:$4 sm:$0xff]   ;;  %v1006_v7 = vld [vmem:[#allocation5 + $0x18] ss:$12 sps:$4 sm:$0xff]  }
  0x6e   : > { %882 = vmatpush3.bf16.msra.mxu1 %v1001_v3  ;;  %449 = vmatpush1.bf16.msra.mxu0 %v1002_v4  ;;  %v1007_v8 = vld [vmem:[#allocation5 + $0x34] ss:$12 sps:$4 sm:$0xff]   ;;  %v1009_v9 = vld [vmem:[#allocation5 + $0x38] ss:$12 sps:$4 sm:$0xff]   ;;  %v1010_v10 = vld [vmem:[#allocation5 + $0x30] ss:$12 sps:$4 sm:$0xff]  }
  0x6f   : > { %883 = vmatprep.subr.bf16.mxu1 %v1222_v0  ;;  %450 = vmatprep.subr.bf16.mxu0 %v1003_v5  ;;  %v1011_v11 = vld [vmem:[#allocation5 + $0x4c] ss:$12 sps:$4 sm:$0xff]   ;;  %v1013_v12 = vld [vmem:[#allocation5 + $0x50] ss:$12 sps:$4 sm:$0xff]   ;;  %v1014_v13 = vld [vmem:[#allocation5 + $0x48] ss:$12 sps:$4 sm:$0xff]  }
  0x70   : > { %v1015_v14 = vld [vmem:[#allocation5 + $0x64] ss:$12 sps:$4 sm:$0xff]   ;;  %v1017_v15 = vld [vmem:[#allocation5 + $0x68] ss:$12 sps:$4 sm:$0xff]   ;;  %v1018_v16 = vld [vmem:[#allocation5 + $0x60] ss:$12 sps:$4 sm:$0xff]  }
  0x71   : > { %v1019_v17 = vld [vmem:[#allocation5 + $0x7c] ss:$12 sps:$4 sm:$0xff]   ;;  %v1021_v18 = vld [vmem:[#allocation5 + $0x80] ss:$12 sps:$4 sm:$0xff]   ;;  %v1022_v19 = vld [vmem:[#allocation5 + $0x78] ss:$12 sps:$4 sm:$0xff]  }
  0x72   : > { %884 = vmatpush3.bf16.msra.mxu1 %v1005_v6  ;;  %451 = vmatpush1.bf16.msra.mxu0 %v1006_v7  ;;  %v1454_v20 = vld [vmem:[%s1436_s6] sm:$0xff]  ;;  %v276_v24 = vsub.f32 0.0, %v1457_v22  ;;  %v1027_v29 = vld [vmem:[#allocation5 + $0xac] ss:$12 sps:$4 sm:$0xff]   ;;  %v533_v50 = vshrl.u32 %v532_v49, 7  ;;  %s271_s12 = scalar_lea.vmem [#allocation8], %s818_s23 }
  0x73   : > { %885 = vmatprep.subr.bf16.mxu1 %v1222_v0  ;;  %452 = vmatprep.subr.bf16.mxu0 %v1007_v8  ;;  %v1023_v21 = vld [vmem:[#allocation5 + $0x94] ss:$12 sps:$4 sm:$0xff]   ;;  %v275_v23 = vsub.f32 0.0, %v1454_v20  ;;  %v1025_v25 = vld [vmem:[#allocation5 + $0x98] ss:$12 sps:$4 sm:$0xff]   ;;  %v1032_v42 = vld [vmem:[#allocation7 + $0x8] sm:$0xff]  }
  0x74   : > { %v1026_v27 = vld [vmem:[#allocation5 + $0x90] ss:$12 sps:$4 sm:$0xff]   ;;  %v279_v28 = vmul.f32 1.442695, %v276_v24  ;;  %v1030_v31 = vld [vmem:[#allocation5 + $0xa8] ss:$12 sps:$4 sm:$0xff]  }
  0x75   : > { %v277_v26 = vmul.f32 1.442695, %v275_v23  ;;  %v1029_v30 = vld [vmem:[#allocation5 + $0xb0] ss:$12 sps:$4 sm:$0xff]   ;;  %v1031_v41 = vld [vmem:[#allocation7] sm:$0xff]   ;;  %v1036_v46 = vld [vmem:[#allocation7 + $0x28] sm:$0xff]  }
  0x76   : > { %886 = vmatpush3.bf16.msra.mxu1 %v1009_v9  ;;  %453 = vmatpush1.bf16.msra.mxu0 %v1010_v10  ;;  %v1033_v43 = vld [vmem:[#allocation7 + $0x10] sm:$0xff]   ;;  %v1034_v44 = vld [vmem:[#allocation7 + $0x18] sm:$0xff]   ;;  %v1035_v45 = vld [vmem:[#allocation7 + $0x20] sm:$0xff]   ;;  %v534_v51 = vadd.s32 8, %v533_v50  ;;  %vm542_vm1 = vcmp.lt.s32.totalorder %v533_v50, 7  ;;  %vm537_vm2 = vcmp.lt.s32.totalorder %v533_v50, 1 }
  0x77   : > { %887 = vmatprep.subr.bf16.mxu1 %v1222_v0  ;;  %454 = vmatprep.subr.bf16.mxu0 %v1011_v11  ;;  %1039 = vpow2.f32 %v277_v26  ;;  %v1037_v47 = vld [vmem:[#allocation7 + $0x30] sm:$0xff]   ;;  %v1038_v48 = vld [vmem:[#allocation7 + $0x38] sm:$0xff]   ;;  %v846_v57 = vld [vmem:[%s1538_s2] ss:$0 sm:$0xff]  ;;  %vm554_vm3 = vcmp.ge.s32.totalorder %v533_v50, 1  ;;  %s717_s13 = sshll.u32 %s271_s12, 4  ;;  %s1486_s13 = int_to_ptr.vmem [resolvable:$true] %s717_s13 }
  0x78   : > { %1041 = vpow2.f32 %v279_v28  ;;  %vm565_vm4 = vcmp.lt.s32.totalorder %v534_v51, 15  ;;  %v847_v28 = vld [vmem:[%s1540_s4] ss:$0 sm:$0xff]  ;;  %s862_s29 = sshll.u32 %s1279_s22, 8  ;;  %s704_s22 = scalar_lea.sflag [#allocation4], %s1430_s17 }
  0x79   : > { %s1491_s11 = scalar_lea.hbm %s1541_s5, %s862_s29  ;;  %s1141_s14 = scalar_lea.vmem %s1486_s13, 256 }
  0x7a   : > { %888 = vmatpush3.bf16.msra.mxu1 %v1013_v12  ;;  %455 = vmatpush1.bf16.msra.mxu0 %v1014_v13  ;;  %p1142_p11 = scmp.ne.s32.totalorder %s1486_s13, %s1141_s14  ;;  %p1555_p0 = scmp.ne.s32.totalorder %s1550_s30, 0 }
  0x7b   : > { %889 = vmatprep.subr.bf16.mxu1 %v1222_v0  ;;  %456 = vmatprep.subr.bf16.mxu0 %v1015_v14  ;;  %s1225_s15 = smov [#allocation8]  }
  0x7c   : > { %p1143_p1 = pnand %p1142_p11, %p1555_p0  ;;  %s1145_s23 = sshll.u32 %s1225_s15, 4  ;;  %s1146_s23 = int_to_ptr.vmem [resolvable:$false] %s1145_s23 }
  0x7d   : > { %s1147_s7 = scalar_lea.vmem %s1146_s23, 512  ;;  %p1148_p5 = scmp.lt.s32.totalorder %s1486_s13, %s1146_s23 }
  0x7e   : > { %890 = vmatpush3.bf16.msra.mxu1 %v1017_v15  ;;  %457 = vmatpush1.bf16.msra.mxu0 %v1018_v16  ;;  %p1144_p3 = pneg %p1143_p1  ;;  %p1149_p9 = scmp.lt.s32.totalorder %s1147_s7, %s1141_s14 }
  0x7f   : > { %891 = vmatprep.subr.bf16.mxu1 %v1222_v0  ;;  %458 = vmatprep.subr.bf16.mxu0 %v1019_v17 }
  0x80   : > { %p1150_p12 = por %p1149_p9, %p1148_p5 }
  0x81   : > { %v1040_v32 = vpop.eup %1039 }
  0x82   : > { %892 = vmatpush3.bf16.msra.mxu1 %v1021_v18  ;;  %459 = vmatpush1.bf16.msra.mxu0 %v1022_v19  ;;  %v1042_v33 = vpop.eup %1041  ;;  %v281_v34 = vadd.f32 1.0, %v1040_v32  ;;  %p1151_p2 = pnand %p1150_p12, %p1144_p3 }
  0x83   : > { %893 = vmatprep.subr.bf16.mxu1 %v1222_v0  ;;  %460 = vmatprep.subr.bf16.mxu0 %v1023_v21  ;;  %v282_v35 = vadd.f32 1.0, %v1042_v33 }
  0x84   : > { %1043 = vrcp.f32 %v281_v34 }
  0x85   : > { %1045 = vrcp.f32 %v282_v35 }
  0x86   : > { %894 = vmatpush3.bf16.msra.mxu1 %v1025_v25  ;;  %461 = vmatpush1.bf16.msra.mxu0 %v1026_v27 }
  0x87   : > { %895 = vmatprep.subr.bf16.mxu1 %v1222_v0  ;;  %462 = vmatprep.subr.bf16.mxu0 %v1027_v29 }
  0x8a   : > { %896 = vmatpush3.bf16.msra.mxu1 %v1029_v30  ;;  %463 = vmatpush1.bf16.msra.mxu0 %v1030_v31 }
  0x8b   : > { %901 = vmatprep.subr.bf16.mxu0 %v1222_v0 }
  0x8e   : > { %v1044_v36 = vpop.eup %1043 }
  0x8f   : > { %v1046_v37 = vpop.eup %1045  ;;  %v285_v38 = vmul.f32 %v1044_v36, %v1454_v20 }
  0x90   : > { %v286_v39 = vmul.f32 %v1046_v37, %v1457_v22 }
  0x92   : > { %v287_v40 = vpack.c.bf16 %v286_v39, %v285_v38 }
  0x94   : > { %898 = vmatmul.mubr.bf16.vlgmr.msra.gmra.mrb[0].mxu1 %v287_v40  ;;  %481 = vmatmul.mubr.bf16.vlgmr.msra.gmra.mrb[0].mxu0 %v287_v40 }
  0x95   : > { %917 = vmatprep.mubr.msk.bf16.mxu0 %vm1223_vm0, %v1222_v0  ;;  %902 = vmatpush3.bf16.msra.mxu0 %v1031_v41 }
  0x96   : > { %903 = vmatprep.subr.bf16.mxu0 %v1222_v0 }
  0x99   : > { %904 = vmatpush3.bf16.msra.mxu0 %v1032_v42 }
  0x9a   : > { %905 = vmatprep.subr.bf16.mxu0 %v1222_v0 }
  0x9d   : > { %906 = vmatpush3.bf16.msra.mxu0 %v1033_v43 }
  0x9e   : > { %907 = vmatprep.subr.bf16.mxu0 %v1222_v0 }
  0xa1   : > { %908 = vmatpush3.bf16.msra.mxu0 %v1034_v44 }
  0xa2   : > { %909 = vmatprep.subr.bf16.mxu0 %v1222_v0 }
  0xa5   : > { %910 = vmatpush3.bf16.msra.mxu0 %v1035_v45 }
  0xa6   : > { %911 = vmatprep.subr.bf16.mxu0 %v1222_v0 }
  0xa9   : > { %912 = vmatpush3.bf16.msra.mxu0 %v1036_v46 }
  0xaa   : > { %913 = vmatprep.subr.bf16.mxu0 %v1222_v0 }
  0xad   : > { %914 = vmatpush3.bf16.msra.mxu0 %v1037_v47 }
  0xae   : > { %915 = vmatprep.subr.bf16.mxu0 %v1222_v0 }
  0xb1   : > { %916 = vmatpush3.bf16.msra.mxu0 %v1038_v48 }
 0x167   : > { %v525_v52 = vpop.f32.mrb[0].mxu1  ;;  %v482_v53 = vpop.f32.mrb[0].mxu0 }
 0x168   : > { %v540_v54 = vrot.slane %v525_v52, 1  ;;  %v899_v55 = vpop.f32.mrb[1].mxu1  ;;  %v484_v56 = vpop.f32.mrb[1].mxu0  ;;  %v535_v60 = vrot.slane %v482_v53, 7 }
 0x169   : > { %v528_v58 = vpop.f32.mrb[2].mxu1  ;;  %v486_v59 = vpop.f32.mrb[2].mxu0  ;;  %v552_v1 = vadd.f32 %v846_v57, %v484_v56 }
 0x16a   : > { %v541_v61 = vrot.slane %v528_v58, 1  ;;  %v536_v62 = vrot.slane %v486_v59, 7  ;;  %v900_v63 = vpop.f32.mrb[3].mxu1  ;;  %v488_v0 = vpop.f32.mrb[3].mxu0 }
 0x16b   : > { %v553_v2 = vadd.f32 %v846_v57, %v488_v0 }
 0x16c   : > { %v543_v3 = vsel %vm542_vm1, %v540_v54, %v541_v61  ;;  %v544_v4 = vsel %vm542_vm1, %v541_v61, %v540_v54  ;;  %v539_v5 = vsel %vm537_vm2, %v536_v62, %v535_v60  ;;  %v538_v6 = vsel %vm537_vm2, %v535_v60, %v536_v62 }
 0x16d   : > { %v560_v7 = vsel %vm554_vm3, %v539_v5, 0.0  ;;  %v563_v8 = vadd.f32 %v553_v2, %v538_v6  ;;  %v571_v9 = vsel %vm565_vm4, %v544_v4, 0.0 }
 0x16e   : > { %v562_v10 = vadd.f32 %v560_v7, %v552_v1 }
 0x16f   : > { %v573_v11 = vadd.f32 %v571_v9, %v563_v8 }
 0x170   : > { %v572_v12 = vadd.f32 %v562_v10, %v543_v3 }
 0x171   : > { %v575_v13 = vsub.f32 0.0, %v573_v11 }
 0x172   : > { %v574_v14 = vsub.f32 0.0, %v572_v12 }
 0x173   : > { %v578_v15 = vmul.f32 1.442695, %v575_v13 }
 0x174   : > { %v576_v16 = vmul.f32 1.442695, %v574_v14 }
 0x175   : > { %1047 = vpow2.f32 %v578_v15 }
 0x176   : > { %1049 = vpow2.f32 %v576_v16 }
 0x17f   : > { %v1048_v17 = vpop.eup %1047 }
 0x180   : > { %v1050_v18 = vpop.eup %1049  ;;  %v581_v19 = vadd.f32 1.0, %v1048_v17 }
 0x181   : > { %v580_v21 = vadd.f32 1.0, %v1050_v18 }
 0x182   : > { %1051 = vrcp.f32 %v581_v19 }
 0x183   : > { %1053 = vrcp.f32 %v580_v21 }
 0x18c   : > { %v1052_v23 = vpop.eup %1051 }
 0x18d   : > { %v1054_v24 = vpop.eup %1053  ;;  %v585_v25 = vmul.f32 %v1052_v23, %v573_v11 }
 0x18e   : > { %v584_v26 = vmul.f32 %v1054_v24, %v572_v12 }
 0x190   : > { %v586_v27 = vpack.c.bf16 %v585_v25, %v584_v26 }
 0x192   : > { %918 = vmatmul.mubr.bf16.vlgmr.msra.gmra.mrb[4].mxu0 %v586_v27 }
 0x265   : > { %v692_v29 = vpop.f32.mrb[4].mxu0 }
 0x266   : > { %v693_v30 = vadd.f32 %v847_v28, %v692_v29  ;;  %v919_v31 = vpop.f32.mrb[5].mxu0 }
 0x267   : > { %v695_v32 = vpop.f32.mrb[6].mxu0 }
 0x268   : > { %v699_v33 = vadd.f32 %v693_v30, %v1454_v20  ;;  %v696_v34 = vadd.f32 %v847_v28, %v695_v32  ;;  %v920_v35 = vpop.f32.mrb[7].mxu0 }
 0x26a   : > { %701 = vst [vmem:[%s271_s12] sm:$0xff] %v699_v33  ;;  %v700_v36 = vadd.f32 %v696_v34, %v1457_v22 }
 0x26c   : > { %702 = vst [vmem:[%s271_s12 + $0x8] sm:$0xff] %v700_v36 }
 0x26d   : > { %1154 = shalt.err (!%p1151_p2)
}
 0x26e   : > { %s1155_s6 = scalar_lea.hbm %s1491_s11, 256  ;;  %s1159_s10 = scalar_lea.hbm %s1541_s5, 512 }
 0x26f   : > { %p1156_p13 = scmp.ne.s32.totalorder %s1491_s11, %s1155_s6  ;;  %p1160_p4 = scmp.lt.u32.totalorder %s1491_s11, %s1541_s5 }
 0x270   : > { %p1161_p7 = scmp.lt.u32.totalorder %s1159_s10, %s1155_s6  ;;  %p1163_p11 = scmp.lt.u32.totalorder %s1155_s6, %s1491_s11 }
 0x271   : > { %p1157_p6 = pnand %p1156_p13, %p1555_p0 }
 0x272   : > { %p1162_p8 = por %p1161_p7, %p1160_p4 }
 0x273   : > { %p1158_p10 = pneg %p1157_p6 }
 0x274   : > { %p1164_p1 = por %p1163_p11, %p1162_p8 }
 0x276   : > { %p1165_p3 = pnand %p1164_p1, %p1158_p10 }
 0x278   : > { %1168 = shalt.err (!%p1165_p3)
}
 0x279   : > { %s1226_s29 = smov 128   ;;  %s1227_s8 = smov 8  }
 0x27a   : > { %931 = dma.vmem_to_hbm [thread:$0]  (%p1555_p0), %s1486_s13, 256, %s1491_s11, %s704_s22, %s1226_s29, %s1226_s29, %s1227_s8  }
 0x27b PF: > { %s732_s9 = sand.u32 1, %s1199_s18   ;;  %p1556_p5 = scmp.ne.s32.totalorder %s1546_s25, 0 }
 0x27c   : > { %p1557_p9 = scmp.ge.s32.totalorder %s1211_s21, 2  ;;  %s733_s14 = scalar_lea.sflag [#allocation4], %s732_s9 }
 0x27e   : > { %p945_p12 = pnand %p1557_p9, %p1556_p5 }
 0x280   : > { %1194 = dma.done.wait (!%p945_p12), %s733_s14, 256  }
 0x281   : > { %1196 = vsyncadd (!%p945_p12), %s733_s14, 4294967040  ;;  %p19_p2 = scmp.ge.s32.totalorder %s1368_s16, 4   ;;  %s1558_s18 = smov %s1203_s19 }
 0x282   : > { %s1559_s19 = smov %s1207_s20  ;;  %s1560_s20 = smov %s1377_s27 }
 0x283   : > { %s1561_s21 = smov %s1368_s16  ;;  %21 = sbr.rel (!%p19_p2) target bundleno = 6 (0x6), region = 93 }
 0x28a   :  { %738 = vsyncpa [#allocation3], 1 }
 0x28b   :  { %740 = vsyncpa [#allocation3 + $0x1], 1 }
 0x28c   :  { %741 = vsyncpa [#allocation6], 1 }
 0x28d   :  { %742 = vsyncpa [#allocation4], 1 }
 0x28e   :  { %744 = vsyncpa [#allocation4 + $0x1], 1 }

</bundles_post_ra>
